<compile_context>
chip_gen: v6e
topology: v6e:2x2x1
jax: 0.10.0
libtpu: 0.0.40
codegen_flags: <defaults>
</compile_context>

<pallas_src>
import jax
import jax.numpy as jnp
from jax.experimental import pallas as pl
from jax.experimental.pallas import tpu as pltpu


# ----------------------------------------------------------------------------
# Fused SE-block kernel (one batch element per grid step)
# ----------------------------------------------------------------------------
def _se_kernel(x_ref, w1_ref, w2_ref, o_ref):
    """x_ref / o_ref: (1, C, H*W); w1_ref: (C//r, C); w2_ref: (C, C//r).

    Weights are in PyTorch nn.Linear layout (out_features, in_features),
    so fc(y) for a column vector y is simply W @ y.
    """
    x = x_ref[0].astype(jnp.float32)                       # (C, HW)
    hw = x.shape[-1]

    # Squeeze: global average pool over the lane (pixel) axis -> (C, 1).
    y = jnp.sum(x, axis=-1, keepdims=True) * (1.0 / hw)

    # Excitation: two tiny bias-free FCs on VMEM-resident data.
    h = jnp.dot(w1_ref[...].astype(jnp.float32), y,
                preferred_element_type=jnp.float32)        # (C//r, 1)
    h = jnp.maximum(h, 0.0)                                # ReLU
    s = jnp.dot(w2_ref[...].astype(jnp.float32), h,
                preferred_element_type=jnp.float32)        # (C, 1)
    s = 1.0 / (1.0 + jnp.exp(-s))                          # sigmoid (EUP)

    # Scale: broadcast the per-channel gate over lanes, fused with the store.
    o_ref[0] = (x * s).astype(o_ref.dtype)


def se_block_forward(x, w1, w2):
    """SEBlock forward.

    x : (B, C, H, W) NCHW input (as in the PyTorch module).
    w1: (C//reduction, C)  -- weight of nn.Linear(C, C//r, bias=False).
    w2: (C, C//reduction)  -- weight of nn.Linear(C//r, C, bias=False).
    Returns (B, C, H, W).
    """
    B, C, H, W = x.shape
    hw = H * W
    x3 = x.reshape(B, C, hw)  # free reshape (contiguous NCHW memory)

    out = pl.pallas_call(
        _se_kernel,
        out_shape=jax.ShapeDtypeStruct((B, C, hw), x.dtype),
        grid_spec=pltpu.PrefetchScalarGridSpec(
            num_scalar_prefetch=0,
            grid=(B,),
            in_specs=[
                # Full (C, HW) slab for one batch element; block dims equal
                # the full array dims, so no (8, 128) padding is required.
                pl.BlockSpec((1, C, hw), lambda b: (b, 0, 0)),
                pl.BlockSpec((w1.shape[0], w1.shape[1]), lambda b: (0, 0)),
                pl.BlockSpec((w2.shape[0], w2.shape[1]), lambda b: (0, 0)),
            ],
            out_specs=pl.BlockSpec((1, C, hw), lambda b: (b, 0, 0)),
        ),
        compiler_params=pltpu.CompilerParams(
            dimension_semantics=("parallel",)),
    )(x3, w1, w2)
    return out.reshape(B, C, H, W)


# ----------------------------------------------------------------------------
# Pure-JAX reference (mirrors the PyTorch module exactly)
# ----------------------------------------------------------------------------
def se_block_ref(x, w1, w2):
    y = jnp.mean(x, axis=(2, 3))                 # (B, C)   AdaptiveAvgPool2d(1)
    h = jnp.maximum(y @ w1.T, 0.0)               # Linear(C, C//r, bias=False)+ReLU
    s = 1.0 / (1.0 + jnp.exp(-(h @ w2.T)))       # Linear(C//r, C, bias=False)+Sigmoid
    return x * s[:, :, None, None]


if __name__ == "__main__":
    key = jax.random.PRNGKey(0)
    kx, k1, k2 = jax.random.split(key, 3)

    # Small shapes consistent with the module: reduction=16 requires
    # channel >= 16; use batch=2, channel=64 (hidden=4), spatial 16x16.
    B, C, H, W, R = 2, 64, 16, 16, 16
    Cr = C // R

    x = jax.random.normal(kx, (B, C, H, W), jnp.float32)
    w1 = jax.random.normal(k1, (Cr, C), jnp.float32) / jnp.sqrt(jnp.float32(C))
    w2 = jax.random.normal(k2, (C, Cr), jnp.float32) / jnp.sqrt(jnp.float32(Cr))

    fwd = jax.jit(se_block_forward)
    y = fwd(x, w1, w2)
    jax.block_until_ready(y)

    assert y.shape == (B, C, H, W), y.shape
    ref = se_block_ref(x, w1, w2)
    assert bool(jnp.all(jnp.isfinite(y)))
    assert bool(jnp.allclose(y, ref, atol=1e-5, rtol=1e-5)), \
        float(jnp.max(jnp.abs(y - ref)))
    print("KERNEL_OK")
</pallas_src>

<mosaic_0001>
module attributes {stable_mosaic.version = 11 : i64} {
  func.func @_se_kernel(%arg0: i32, %arg1: memref<1x64x256xf32, #tpu.memory_space<vmem>>, %arg2: memref<4x64xf32, #tpu.memory_space<vmem>>, %arg3: memref<64x4xf32, #tpu.memory_space<vmem>>, %arg4: memref<1x64x256xf32, #tpu.memory_space<vmem>>) attributes {dimension_semantics = [#tpu.dimension_semantics<parallel>], iteration_bounds = array<i64: 2>, scalar_prefetch = 0 : i64, scratch_operands = 0 : i64, tpu.core_type = #tpu.core_type<tc>, window_params = [{transform_indices = @transform_0, window_bounds = array<i64: 1, 64, 256>}, {pipeline_mode = #tpu.pipeline_mode<synchronous>, transform_indices = @transform_1, window_bounds = array<i64: 4, 64>}, {pipeline_mode = #tpu.pipeline_mode<synchronous>, transform_indices = @transform_2, window_bounds = array<i64: 64, 4>}, {transform_indices = @transform_3, window_bounds = array<i64: 1, 64, 256>}]} {
    %c0 = arith.constant 0 : index
    %c0_0 = arith.constant 0 : index
    %c0_1 = arith.constant 0 : index
    %0 = vector.load %arg1[%c0, %c0_0, %c0_1] : memref<1x64x256xf32, #tpu.memory_space<vmem>>, vector<1x64x256xf32>
    %1 = vector.shape_cast %0 : vector<1x64x256xf32> to vector<64x256xf32>
    %cst = arith.constant dense<0.000000e+00> : vector<64xf32>
    %2 = vector.multi_reduction <add>, %1, %cst [1] : vector<64x256xf32> to vector<64xf32>
    %3 = vector.shape_cast %2 : vector<64xf32> to vector<64x1xf32>
    %cst_2 = arith.constant 3.906250e-03 : f32
    %4 = vector.broadcast %cst_2 : f32 to vector<64x1xf32>
    %5 = arith.mulf %3, %4 : vector<64x1xf32>
    %c0_3 = arith.constant 0 : index
    %c0_4 = arith.constant 0 : index
    %6 = vector.load %arg2[%c0_3, %c0_4] : memref<4x64xf32, #tpu.memory_space<vmem>>, vector<4x64xf32>
    %cst_5 = arith.constant dense<0.000000e+00> : vector<4x1xf32>
    %7 = tpu.matmul %6, %5, %cst_5 {dimension_numbers = #tpu.dot_dimension_numbers<[1], [0], [0], [1], [0, 0, 1, 1], [], []>} : vector<4x64xf32>, vector<64x1xf32>, vector<4x1xf32> -> vector<4x1xf32>
    %cst_6 = arith.constant 0.000000e+00 : f32
    %8 = vector.broadcast %cst_6 : f32 to vector<4x1xf32>
    %9 = arith.maximumf %7, %8 : vector<4x1xf32>
    %c0_7 = arith.constant 0 : index
    %c0_8 = arith.constant 0 : index
    %10 = vector.load %arg3[%c0_7, %c0_8] : memref<64x4xf32, #tpu.memory_space<vmem>>, vector<64x4xf32>
    %cst_9 = arith.constant dense<0.000000e+00> : vector<64x1xf32>
    %11 = tpu.matmul %10, %9, %cst_9 {dimension_numbers = #tpu.dot_dimension_numbers<[1], [0], [0], [1], [0, 0, 1, 1], [], []>} : vector<64x4xf32>, vector<4x1xf32>, vector<64x1xf32> -> vector<64x1xf32>
    %cst_10 = arith.constant 0.000000e+00 : f32
    %12 = vector.broadcast %cst_10 : f32 to vector<64x1xf32>
    %13 = arith.subf %12, %11 : vector<64x1xf32>
    %14 = math.exp %13 : vector<64x1xf32>
    %cst_11 = arith.constant 1.000000e+00 : f32
    %15 = vector.broadcast %cst_11 : f32 to vector<64x1xf32>
    %16 = arith.addf %15, %14 : vector<64x1xf32>
    %cst_12 = arith.constant 1.000000e+00 : f32
    %17 = vector.broadcast %cst_12 : f32 to vector<64x1xf32>
    %18 = arith.divf %17, %16 : vector<64x1xf32>
    %19 = vector.broadcast %18 : vector<64x1xf32> to vector<64x256xf32>
    %20 = arith.mulf %1, %19 : vector<64x256xf32>
    %c0_13 = arith.constant 0 : index
    %c0_14 = arith.constant 0 : index
    %c0_15 = arith.constant 0 : index
    %21 = vector.load %arg4[%c0_13, %c0_14, %c0_15] : memref<1x64x256xf32, #tpu.memory_space<vmem>>, vector<1x64x256xf32>
    %22 = vector.shape_cast %21 : vector<1x64x256xf32> to vector<64x256xf32>
    %23 = vector.shape_cast %20 : vector<64x256xf32> to vector<1x64x256xf32>
    tpu.vector_store %arg4[%c0_13, %c0_14, %c0_15], %23 {strides = array<i32>} : memref<1x64x256xf32, #tpu.memory_space<vmem>>, vector<1x64x256xf32>,
    return
  }
  func.func @transform_0(%arg0: i32) -> (i32, i32, i32) {
    %c0_i32 = arith.constant 0 : i32
    %c0_i32_0 = arith.constant 0 : i32
    %c0_i32_1 = arith.constant 0 : i32
    return %arg0, %c0_i32, %c0_i32_0 : i32, i32, i32
  }
  func.func @transform_1(%arg0: i32) -> (i32, i32) {
    %c0_i32 = arith.constant 0 : i32
    %c0_i32_0 = arith.constant 0 : i32
    %c0_i32_1 = arith.constant 0 : i32
    return %c0_i32, %c0_i32_0 : i32, i32
  }
  func.func @transform_2(%arg0: i32) -> (i32, i32) {
    %c0_i32 = arith.constant 0 : i32
    %c0_i32_0 = arith.constant 0 : i32
    %c0_i32_1 = arith.constant 0 : i32
    return %c0_i32, %c0_i32_0 : i32, i32
  }
  func.func @transform_3(%arg0: i32) -> (i32, i32, i32) {
    %c0_i32 = arith.constant 0 : i32
    %c0_i32_0 = arith.constant 0 : i32
    %c0_i32_1 = arith.constant 0 : i32
    return %arg0, %c0_i32, %c0_i32_0 : i32, i32, i32
  }
}

</mosaic_0001>

<bundles_post_ra>
// kernel: se_block_forward.1
= control target key start
LH: loop header
LB: loop body
LE: loop exit
PB: predicated region body
PF: predicated region fallthrough
CT: control target
= control target key end

     0   :  { %s762_s12 = smov 0   ;;  %s903_s0 = inlined_call_operand.vmem [shape: f32[2,64,256], index: 0, kind: input, shape index: {}]   ;;  %s904_s1 = inlined_call_operand.vmem [shape: f32[4,64], index: 1, kind: input, shape index: {}]   ;;  %s905_s2 = inlined_call_operand.vmem [shape: f32[64,4], index: 2, kind: input, shape index: {}]   ;;  %s906_s3 = inlined_call_operand.vmem [shape: f32[2,64,256], index: 3, kind: output, shape index: {}]  }
   0x1 LB: > { %s612_s13 = sadd.s32 4294967295, %s737_s12   ;;  %p616_p0 = scmp.ge.s32.totalorder %s737_s12, 1  ;;  %s737_s12 = sphi %s762_s12, %s13_s12  }
   0x2   : > { %p137_p1 = scmp.lt.s32.totalorder %s737_s12, 3 }
   0x4   : > { %p138_p2 = pnand %p616_p0, %p137_p1 }
   0x5   : > { %p161_p3 = scmp.lt.s32.totalorder (!%p138_p2), %s612_s13, 1 }
   0x6   : > { %141 = sbr.rel (%p138_p2) target bundleno = 749 (0x2ed), region = 32 }
   0xb   : > { %s908_s13 = smov (!%p161_p3, %s612_s13), 1  ;;  %v739_v24 = vmov 0.0   ;;  %vm740_vm0 = vmmov 0   ;;  %v219_v41 = vld [vmem:[%s904_s1] sm:$0xf]  ;;  %vm220_vm1 = vcmask 523264  }
   0xc   : > { %s633_s14 = sshll.u32 %s908_s13, 7  ;;  %653 = vmatprep.subr.mxu0 %v739_v24  ;;  %669 = vmatprep.mubr.msk.f32.mxu0 %vm740_vm0, %v739_v24  ;;  %v295_v42 = vld [vmem:[%s905_s2] sm:$0xff]  ;;  %vm303_vm2 = vcmask 31744   ;;  %vm328_vm3 = vcmask 1043456   ;;  %v296_v46 = vld [vmem:[%s905_s2 + $0x8] sm:$0xff]  ;;  %v297_v47 = vld [vmem:[%s905_s2 + $0x10] sm:$0xff] }
   0xd   : > { %s165_s17 = scalar_lea.vmem %s903_s0, %s633_s14  ;;  %674 = vmatprep.mubr.msk.f32.mxu1 %vm303_vm2, %v295_v42  ;;  %v298_v48 = vld [vmem:[%s905_s2 + $0x18] sm:$0xff]  ;;  %v299_v49 = vld [vmem:[%s905_s2 + $0x20] sm:$0xff]  ;;  %v300_v50 = vld [vmem:[%s905_s2 + $0x28] sm:$0xff]  ;;  %v741_v53 = vmov 0   ;;  %s866_s11 = scalar_lea.vmem %s906_s3, %s633_s14 }
   0xe   : > { %v778_v0 = vld [vmem:[%s165_s17 + $0x70] sm:$0xff]  ;;  %v780_v1 = vld [vmem:[%s165_s17 + $0x78] sm:$0xff]  ;;  %v782_v2 = vld [vmem:[%s165_s17 + $0x60] sm:$0xff]  ;;  %698 = vset.pattern.permute.xlu1 %v741_v53  ;;  %697 = vset.pattern.permute.xlu0 %v741_v53 }
   0xf   : > { %v208_v3 = vadd.f32 %v780_v1, %v778_v0  ;;  %v786_v4 = vld [vmem:[%s165_s17 + $0x68] sm:$0xff]  ;;  %v788_v5 = vld [vmem:[%s165_s17 + $0x50] sm:$0xff]  ;;  %v790_v6 = vld [vmem:[%s165_s17 + $0x58] sm:$0xff] }
  0x10   : > { %v202_v7 = vadd.f32 %v790_v6, %v788_v5  ;;  %v794_v8 = vld [vmem:[%s165_s17 + $0x40] sm:$0xff]  ;;  %v796_v9 = vld [vmem:[%s165_s17 + $0x48] sm:$0xff]  ;;  %v205_v10 = vadd.f32 %v786_v4, %v782_v2  ;;  %v802_v12 = vld [vmem:[%s165_s17 + $0x30] sm:$0xff] }
  0x11   : > { %209 = vadd.xlane.f32.xlu0 %v208_v3  ;;  %v199_v11 = vadd.f32 %v796_v9, %v794_v8  ;;  %v804_v13 = vld [vmem:[%s165_s17 + $0x38] sm:$0xff]  ;;  %v806_v14 = vld [vmem:[%s165_s17 + $0x20] sm:$0xff]  ;;  %v808_v15 = vld [vmem:[%s165_s17 + $0x28] sm:$0xff] }
  0x12   : > { %203 = vadd.xlane.f32.xlu1 %v202_v7  ;;  %v196_v16 = vadd.f32 %v804_v13, %v802_v12  ;;  %v193_v17 = vadd.f32 %v808_v15, %v806_v14  ;;  %v814_v18 = vld [vmem:[%s165_s17 + $0x10] sm:$0xff]  ;;  %v816_v19 = vld [vmem:[%s165_s17 + $0x18] sm:$0xff]  ;;  %v818_v20 = vld [vmem:[%s165_s17] sm:$0xff] }
  0x13   : > { %v820_v21 = vld [vmem:[%s165_s17 + $0x8] sm:$0xff]  ;;  %v190_v22 = vadd.f32 %v816_v19, %v814_v18  ;;  %v301_v51 = vld [vmem:[%s905_s2 + $0x30] sm:$0xff]  ;;  %v302_v52 = vld [vmem:[%s905_s2 + $0x38] sm:$0xff] }
  0x14   : > { %v187_v23 = vadd.f32 %v820_v21, %v818_v20 }
  0x15   : > { %206 = vadd.xlane.f32.xlu0 %v205_v10 }
  0x16   : > { %200 = vadd.xlane.f32.xlu1 %v199_v11 }
  0x19   : > { %197 = vadd.xlane.f32.xlu0 %v196_v16 }
  0x1a   : > { %194 = vadd.xlane.f32.xlu1 %v193_v17 }
  0x1d   : > { %191 = vadd.xlane.f32.xlu0 %v190_v22 }
  0x1e   : > { %188 = vadd.xlane.f32.xlu1 %v187_v23 }
  0x9a   : > { %v210_v25 = vpop.xlane.xlu0 %209 }
  0x9b   : > { %v218_v26 = vmul.f32 0.00390625, %v210_v25  ;;  %v204_v27 = vpop.xlane.xlu1 %203 }
  0x9c   : > { %v216_v31 = vmul.f32 0.00390625, %v204_v27 }
  0x9d   : > { %654 = vmatpush3.msra.mxu0 %v218_v26 }
  0x9e   : > { %v207_v28 = vpop.xlane.xlu0 %206  ;;  %655 = vmatprep.subr.mxu0 %v739_v24 }
  0x9f   : > { %v217_v29 = vmul.f32 0.00390625, %v207_v28  ;;  %v201_v30 = vpop.xlane.xlu1 %200 }
  0xa0   : > { %v215_v32 = vmul.f32 0.00390625, %v201_v30 }
  0xa1   : > { %656 = vmatpush3.msra.mxu0 %v217_v29 }
  0xa2   : > { %657 = vmatprep.subr.mxu0 %v739_v24  ;;  %v198_v33 = vpop.xlane.xlu0 %197 }
  0xa3   : > { %658 = vmatpush3.msra.mxu0 %v216_v31  ;;  %v214_v34 = vmul.f32 0.00390625, %v198_v33  ;;  %v195_v35 = vpop.xlane.xlu1 %194 }
  0xa4   : > { %659 = vmatprep.subr.mxu0 %v739_v24  ;;  %v213_v36 = vmul.f32 0.00390625, %v195_v35 }
  0xa5   : > { %660 = vmatpush3.msra.mxu0 %v215_v32 }
  0xa6   : > { %661 = vmatprep.subr.mxu0 %v739_v24  ;;  %v192_v37 = vpop.xlane.xlu0 %191 }
  0xa7   : > { %662 = vmatpush3.msra.mxu0 %v214_v34  ;;  %v212_v38 = vmul.f32 0.00390625, %v192_v37  ;;  %v189_v39 = vpop.xlane.xlu1 %188 }
  0xa8   : > { %663 = vmatprep.subr.mxu0 %v739_v24  ;;  %v211_v40 = vmul.f32 0.00390625, %v189_v39 }
  0xa9   : > { %664 = vmatpush3.msra.mxu0 %v213_v36 }
  0xaa   : > { %665 = vmatprep.subr.mxu0 %v739_v24 }
  0xab   : > { %666 = vmatpush3.msra.mxu0 %v212_v38 }
  0xac   : > { %667 = vmatprep.subr.mxu0 %v739_v24 }
  0xad   : > { %668 = vmatpush3.msra.mxu0 %v211_v40 }
  0xae   : > { %670 = vmatmul.mubr.msk.f32.vlgmr.msra.gmra.mxu0 %vm220_vm1, %v219_v41 }
 0x16e   : > { %v290_v43 = vpop.f32.mrf.mxu0 }
 0x16f   : > { %v294_v44 = vmax.f32 %v290_v43, 0.0 }
 0x170   : > { %v671_v45 = vpop.f32.mrf.mxu0 }
 0x171   : > { %672 = vmatprep.subr.msk.mxu1 %vm328_vm3, %v294_v44 }
 0x172   : > { %673 = vmatpush3.msk.msra.mxu1 %vm328_vm3, %v294_v44 }
 0x173   : > { %675 = vmatmul.mubr.msk.f32.vlgmr.msra.gmra.mxu1 %vm303_vm2, %v296_v46 }
 0x174   : > { %677 = vmatprep.mubr.msk.f32.mxu1 %vm303_vm2, %v297_v47 }
 0x177   : > { %678 = vmatmul.mubr.msk.f32.gmra.mxu1 %vm303_vm2, %v298_v48 }
 0x178   : > { %680 = vmatprep.mubr.msk.f32.mxu1 %vm303_vm2, %v299_v49 }
 0x17b   : > { %681 = vmatmul.mubr.msk.f32.gmra.mxu1 %vm303_vm2, %v300_v50 }
 0x17c   : > { %683 = vmatprep.mubr.msk.f32.mxu1 %vm303_vm2, %v301_v51 }
 0x17f   : > { %684 = vmatmul.mubr.msk.f32.gmra.mxu1 %vm303_vm2, %v302_v52 }
 0x233   : > { %v676_v54 = vpop.f32.mrf.mxu1 }
 0x234   : > { %v438_v55 = vsub.f32 0.0, %v676_v54 }
 0x235   : > { %v398_v56 = vpop.f32.mrf.mxu1 }
 0x236   : > { %v447_v57 = vmul.f32 1.442695, %v438_v55  ;;  %v437_v58 = vsub.f32 0.0, %v398_v56 }
 0x237   : > { %v679_v59 = vpop.f32.mrf.mxu1 }
 0x238   : > { %699 = vpow2.f32 %v447_v57  ;;  %v445_v60 = vmul.f32 1.442695, %v437_v58  ;;  %v440_v61 = vsub.f32 0.0, %v679_v59 }
 0x239   : > { %v408_v62 = vpop.f32.mrf.mxu1 }
 0x23a   : > { %701 = vpow2.f32 %v445_v60  ;;  %v451_v63 = vmul.f32 1.442695, %v440_v61  ;;  %v439_v3 = vsub.f32 0.0, %v408_v62 }
 0x23b   : > { %v682_v7 = vpop.f32.mrf.mxu1 }
 0x23c   : > { %703 = vpow2.f32 %v451_v63  ;;  %v449_v10 = vmul.f32 1.442695, %v439_v3  ;;  %v442_v11 = vsub.f32 0.0, %v682_v7 }
 0x23d   : > { %v418_v16 = vpop.f32.mrf.mxu1 }
 0x23e   : > { %705 = vpow2.f32 %v449_v10  ;;  %v455_v17 = vmul.f32 1.442695, %v442_v11  ;;  %v441_v22 = vsub.f32 0.0, %v418_v16 }
 0x23f   : > { %v685_v23 = vpop.f32.mrf.mxu1 }
 0x240   : > { %707 = vpow2.f32 %v455_v17  ;;  %v453_v24 = vmul.f32 1.442695, %v441_v22  ;;  %v444_v27 = vsub.f32 0.0, %v685_v23 }
 0x241   : > { %v428_v25 = vpop.f32.mrf.mxu1 }
 0x242   : > { %v443_v26 = vsub.f32 0.0, %v428_v25  ;;  %709 = vpow2.f32 %v453_v24  ;;  %v459_v32 = vmul.f32 1.442695, %v444_v27 }
 0x244   : > { %v457_v28 = vmul.f32 1.442695, %v443_v26 }
 0x245   : > { %v700_v29 = vpop.eup %699 }
 0x246   : > { %v462_v30 = vadd.f32 1.0, %v700_v29  ;;  %711 = vpow2.f32 %v457_v28 }
 0x247   : > { %v702_v31 = vpop.eup %701 }
 0x248   : > { %713 = vrcp.f32 %v462_v30  ;;  %v461_v33 = vadd.f32 1.0, %v702_v31 }
 0x249   : > { %v704_v34 = vpop.eup %703 }
 0x24a   : > { %715 = vrcp.f32 %v461_v33  ;;  %v464_v35 = vadd.f32 1.0, %v704_v34 }
 0x24b   : > { %v706_v36 = vpop.eup %705  ;;  %717 = vpow2.f32 %v459_v32 }
 0x24c   : > { %719 = vrcp.f32 %v464_v35  ;;  %v463_v37 = vadd.f32 1.0, %v706_v36 }
 0x24d   : > { %v708_v38 = vpop.eup %707 }
 0x24e   : > { %v466_v39 = vadd.f32 1.0, %v708_v38  ;;  %721 = vrcp.f32 %v463_v37 }
 0x24f   : > { %v710_v40 = vpop.eup %709 }
 0x250   : > { %723 = vrcp.f32 %v466_v39  ;;  %v465_v42 = vadd.f32 1.0, %v710_v40 }
 0x252   : > { %725 = vrcp.f32 %v465_v42 }
 0x253   : > { %v712_v41 = vpop.eup %711 }
 0x254   : > { %v467_v46 = vadd.f32 1.0, %v712_v41 }
 0x255   : > { %v714_v43 = vpop.eup %713 }
 0x256   : > { %492 = vperm.xlu1 %698, %v714_v43   ;;  %727 = vrcp.f32 %v467_v46 }
 0x257   : > { %v716_v44 = vpop.eup %715 }
 0x258   : > { %v718_v45 = vpop.eup %717  ;;  %487 = vperm.xlu0 %697, %v716_v44  }
 0x259   : > { %v720_v47 = vpop.eup %719  ;;  %v468_v48 = vadd.f32 1.0, %v718_v45 }
 0x25a   : > { %502 = vperm.xlu1 %698, %v720_v47  }
 0x25b   : > { %v722_v49 = vpop.eup %721  ;;  %729 = vrcp.f32 %v468_v48 }
 0x25d   : > { %v724_v50 = vpop.eup %723 }
 0x25e   : > { %497 = vperm.xlu1 %698, %v722_v49  }
 0x25f   : > { %v726_v51 = vpop.eup %725 }
 0x262   : > { %512 = vperm.xlu1 %698, %v724_v50  }
 0x263   : > { %v728_v52 = vpop.eup %727 }
 0x266   : > { %507 = vperm.xlu1 %698, %v726_v51  }
 0x268   : > { %v730_v53 = vpop.eup %729 }
 0x26a   : > { %517 = vperm.xlu1 %698, %v728_v52  }
 0x26e   : > { %522 = vperm.xlu1 %698, %v730_v53  }
 0x2d1   : > { %v493_v54 = vpop.permute.xlu1 %492 }
 0x2d2   : > { %v527_v55 = vmul.f32 %v493_v54, %v814_v18  ;;  %v528_v56 = vmul.f32 %v493_v54, %v816_v19 }
 0x2d3   : > { %v488_v57 = vpop.permute.xlu0 %487 }
 0x2d4   : > { %543 = vst [vmem:[%s866_s11 + $0x10] sm:$0xff] %v527_v55  ;;  %544 = vst [vmem:[%s866_s11 + $0x18] sm:$0xff] %v528_v56  ;;  %v525_v58 = vmul.f32 %v488_v57, %v818_v20  ;;  %v526_v59 = vmul.f32 %v488_v57, %v820_v21 }
 0x2d5   : > { %v503_v60 = vpop.permute.xlu1 %502 }
 0x2d6   : > { %541 = vst [vmem:[%s866_s11] sm:$0xff] %v525_v58  ;;  %542 = vst [vmem:[%s866_s11 + $0x8] sm:$0xff] %v526_v59  ;;  %v531_v61 = vmul.f32 %v503_v60, %v802_v12  ;;  %v532_v18 = vmul.f32 %v503_v60, %v804_v13 }
 0x2d8   : > { %547 = vst [vmem:[%s866_s11 + $0x30] sm:$0xff] %v531_v61  ;;  %548 = vst [vmem:[%s866_s11 + $0x38] sm:$0xff] %v532_v18 }
 0x2d9   : > { %v498_v19 = vpop.permute.xlu1 %497 }
 0x2da   : > { %v529_v62 = vmul.f32 %v498_v19, %v806_v14  ;;  %v530_v20 = vmul.f32 %v498_v19, %v808_v15 }
 0x2dc   : > { %545 = vst [vmem:[%s866_s11 + $0x20] sm:$0xff] %v529_v62  ;;  %546 = vst [vmem:[%s866_s11 + $0x28] sm:$0xff] %v530_v20 }
 0x2dd   : > { %v513_v21 = vpop.permute.xlu1 %512 }
 0x2de   : > { %v535_v63 = vmul.f32 %v513_v21, %v788_v5  ;;  %v536_v12 = vmul.f32 %v513_v21, %v790_v6 }
 0x2e0   : > { %551 = vst [vmem:[%s866_s11 + $0x50] sm:$0xff] %v535_v63  ;;  %552 = vst [vmem:[%s866_s11 + $0x58] sm:$0xff] %v536_v12 }
 0x2e1   : > { %v508_v13 = vpop.permute.xlu1 %507 }
 0x2e2   : > { %v533_v3 = vmul.f32 %v508_v13, %v794_v8  ;;  %v534_v14 = vmul.f32 %v508_v13, %v796_v9 }
 0x2e4   : > { %549 = vst [vmem:[%s866_s11 + $0x40] sm:$0xff] %v533_v3  ;;  %550 = vst [vmem:[%s866_s11 + $0x48] sm:$0xff] %v534_v14 }
 0x2e5   : > { %v518_v15 = vpop.permute.xlu1 %517 }
 0x2e6   : > { %v537_v7 = vmul.f32 %v518_v15, %v782_v2  ;;  %v538_v10 = vmul.f32 %v518_v15, %v786_v4 }
 0x2e8   : > { %553 = vst [vmem:[%s866_s11 + $0x60] sm:$0xff] %v537_v7  ;;  %554 = vst [vmem:[%s866_s11 + $0x68] sm:$0xff] %v538_v10 }
 0x2e9   : > { %v523_v5 = vpop.permute.xlu1 %522 }
 0x2ea   : > { %v539_v6 = vmul.f32 %v523_v5, %v778_v0  ;;  %v540_v11 = vmul.f32 %v523_v5, %v780_v1 }
 0x2ec   : > { %555 = vst [vmem:[%s866_s11 + $0x70] sm:$0xff] %v539_v6  ;;  %556 = vst [vmem:[%s866_s11 + $0x78] sm:$0xff] %v540_v11 }
 0x2ed PF: > { %s13_s12 = sadd.s32 1, %s737_s12  }
 0x2ee   : > { %p10_p4 = scmp.ge.s32.totalorder %s13_s12, 4  }
 0x2f0   :  { %12 = sbr.rel (!%p10_p4) target bundleno = 1 (0x1), region = 62 }

</bundles_post_ra>
